<compile_context>
chip_gen: v5e
topology: v5e:2x2
jax: 0.10.0
libtpu: 0.0.40
codegen_flags: <defaults>
</compile_context>

<pallas_src>
import jax
import jax.numpy as jnp
from jax import lax
from jax.experimental import pallas as pl
from jax.experimental.pallas import tpu as pltpu


def _proj_kernel(x_ref, w_ref, q_ref, kv_ref):
    # x_ref:  (1, Tt, C)     bf16
    # w_ref:  (C, 5*Hp)      bf16   fused [q1*scale | q2*scale | k1 | k2 | v]
    # q_ref:  (1, Tt, 2*Hp)  bf16   [q1*scale | q2*scale]
    # kv_ref: (1, Tt, 3*Hp)  bf16   [k1 | k2 | v]
    hp2 = q_ref.shape[2]
    proj = jnp.dot(x_ref[0], w_ref[...],
                   preferred_element_type=jnp.float32)          # (Tt, 5*Hp)
    q_ref[0] = proj[:, :hp2].astype(jnp.bfloat16)
    kv_ref[0] = proj[:, hp2:].astype(jnp.bfloat16)


def _attn_kernel(lamb_ref, q_ref, kv_ref, o_ref):
    # lamb_ref: (1,)          f32 in SMEM
    # q_ref:    (1, TQ, 2*Hp) bf16   query tile (pre-scaled q1 | q2)
    # kv_ref:   (1, T, 3*Hp)  bf16   full sequence (k1 | k2 | v)
    # o_ref:    (1, TQ, Hp)   f32
    hp = o_ref.shape[2]

    q = q_ref[0]                         # (TQ, 2*Hp)
    kv = kv_ref[0]                       # (T,  3*Hp)
    q1, q2 = q[:, :hp], q[:, hp:]
    k1 = kv[:, 0 * hp:1 * hp]
    k2 = kv[:, 1 * hp:2 * hp]
    v = kv[:, 2 * hp:3 * hp]

    # QK^T: contract the head dim of both operands (MXU-native transposed-RHS;
    # no per-step relayout of the (T, Hp) K slabs).
    dn = (((1,), (1,)), ((), ()))
    s1 = lax.dot_general(q1, k1, dn, preferred_element_type=jnp.float32)  # (TQ, T)
    s2 = lax.dot_general(q2, k2, dn, preferred_element_type=jnp.float32)  # (TQ, T)

    # Unnormalized, numerically stable softmax numerators; sums/maxes in f32.
    e1 = jnp.exp(s1 - jnp.max(s1, axis=-1, keepdims=True))
    e2 = jnp.exp(s2 - jnp.max(s2, axis=-1, keepdims=True))
    l1 = jnp.sum(e1, axis=-1, keepdims=True)                  # (TQ, 1)
    l2 = jnp.sum(e2, axis=-1, keepdims=True)
    p1 = e1.astype(jnp.bfloat16)                               # MXU-native dtype
    p2 = e2.astype(jnp.bfloat16)

    # TODO(synk): dropout on the attention weights omitted (inference mode).
    o1 = jnp.dot(p1, v, preferred_element_type=jnp.float32)    # (TQ, Hp)
    o2 = jnp.dot(p2, v, preferred_element_type=jnp.float32)

    # Deferred normalization + lambda, applied at (TQ,1)/(TQ,Hp) width only.
    inv1 = pl.reciprocal(l1, approx=False)
    inv2 = lamb_ref[0] * pl.reciprocal(l2, approx=False)
    o_ref[0] = (o1 * inv1 - o2 * inv2).astype(o_ref.dtype)


def _pick_tile(n, pref=256):
    """Largest multiple-of-8 tile <= pref dividing n, else the full extent."""
    if n <= pref:
        return n
    for t in range(pref, 7, -8):
        if n % t == 0:
            return t
    return n


def _vmem_limit(need_bytes):
    # 1.5x headroom, never below the 32 MiB default, never above v7x's 64 MiB.
    return int(min(max(need_bytes * 3 // 2 + (2 << 20), 32 << 20), 64 << 20))


def head_forward(x, lamb, wk1, wq1, wk2, wq2, wv):
    """x: (B, T, C) f32; lamb: scalar f32; w*: (C, H) f32 (already transposed)."""
    B, T, C = x.shape
    H = wk1.shape[1]
    Hp = ((H + 127) // 128) * 128          # lane-dense padded head dim
    scale = jnp.float32(H) ** -0.5         # folded into the q weight columns

    def _pad(w):
        return jnp.pad(w, ((0, 0), (0, Hp - H)))

    # Fused, padded, pre-scaled projection weights: (C, 5*Hp) bf16.
    w_fused = jnp.concatenate(
        [_pad(wq1) * scale, _pad(wq2) * scale, _pad(wk1), _pad(wk2), _pad(wv)],
        axis=1).astype(jnp.bfloat16)
    x_bf16 = x.astype(jnp.bfloat16)        # halves x DMA vs f32
    lamb_arr = jnp.asarray(lamb, jnp.float32).reshape((1,))

    # 256 fills the 256-wide MXU on v6e/v7x; on v5e it is simply 2 pushes.
    Tt = _pick_tile(T, 256)
    TQ = _pick_tile(T, 256)
    nt, nq = T // Tt, T // TQ

    # ---- 1) fused projection -------------------------------------------------
    proj_need = (2 * Tt * C * 2 + 2 * C * 5 * Hp * 2
                 + 2 * Tt * 2 * Hp * 2 + 2 * Tt * 3 * Hp * 2
                 + Tt * 5 * Hp * (4 + 2))
    q12, kv = pl.pallas_call(
        _proj_kernel,
        out_shape=(jax.ShapeDtypeStruct((B, T, 2 * Hp), jnp.bfloat16),
                   jax.ShapeDtypeStruct((B, T, 3 * Hp), jnp.bfloat16)),
        grid=(B, nt),
        in_specs=[
            pl.BlockSpec((1, Tt, C), lambda b, t: (b, t, 0)),
            pl.BlockSpec((C, 5 * Hp), lambda b, t: (0, 0)),
        ],
        out_specs=(
            pl.BlockSpec((1, Tt, 2 * Hp), lambda b, t: (b, t, 0)),
            pl.BlockSpec((1, Tt, 3 * Hp), lambda b, t: (b, t, 0)),
        ),
        compiler_params=pltpu.CompilerParams(
            dimension_semantics=("parallel", "parallel"),
            vmem_limit_bytes=_vmem_limit(proj_need)),
    )(x_bf16, w_fused)

    # ---- 2) differential attention -------------------------------------------
    attn_need = (2 * TQ * 2 * Hp * 2 + 2 * T * 3 * Hp * 2 + 2 * TQ * Hp * 4
                 + 4 * TQ * T * 4 + 2 * TQ * T * 2 + 2 * TQ * Hp * 4)
    out_padded = pl.pallas_call(
        _attn_kernel,
        out_shape=jax.ShapeDtypeStruct((B, T, Hp), jnp.float32),
        grid=(B, nq),
        in_specs=[
            pl.BlockSpec(memory_space=pltpu.SMEM),                  # lamb scalar
            pl.BlockSpec((1, TQ, 2 * Hp), lambda b, q: (b, q, 0)),  # q tile
            pl.BlockSpec((1, T, 3 * Hp), lambda b, q: (b, 0, 0)),   # full k1|k2|v
        ],
        out_specs=pl.BlockSpec((1, TQ, Hp), lambda b, q: (b, q, 0)),
        compiler_params=pltpu.CompilerParams(
            dimension_semantics=("parallel", "parallel"),
            vmem_limit_bytes=_vmem_limit(attn_need)),
    )(lamb_arr, q12, kv)

    # TODO(synk): for very long T on v7x (64 MiB VMEM) the (TQ, T) score
    # temporaries should be K-tiled with a flash-style online softmax.
    return out_padded[:, :, :H]


def _reference(x, lamb, wk1, wq1, wk2, wq2, wv):
    k1 = x @ wk1
    q1 = x @ wq1
    k2 = x @ wk2
    q2 = x @ wq2
    v = x @ wv
    scale = k1.shape[-1] ** -0.5
    w1 = jax.nn.softmax(jnp.einsum("bqh,bkh->bqk", q1, k1) * scale, axis=-1)
    w2 = jax.nn.softmax(jnp.einsum("bqh,bkh->bqk", q2, k2) * scale, axis=-1)
    wei = w1 - lamb * w2
    return jnp.einsum("bqk,bkh->bqh", wei, v)


if __name__ == "__main__":
    B, T, C, H = 2, 8, 32, 16
    key = jax.random.PRNGKey(0)
    kx, k1, k2, k3, k4, k5 = jax.random.split(key, 6)

    x = jax.random.normal(kx, (B, T, C), jnp.float32)
    # nn.Linear(embedding_dim, head_size, bias=False) weights, stored transposed (C, H)
    bound = 1.0 / (C ** 0.5)
    wk1 = jax.random.uniform(k1, (C, H), jnp.float32, -bound, bound)
    wq1 = jax.random.uniform(k2, (C, H), jnp.float32, -bound, bound)
    wk2 = jax.random.uniform(k3, (C, H), jnp.float32, -bound, bound)
    wq2 = jax.random.uniform(k4, (C, H), jnp.float32, -bound, bound)
    wv = jax.random.uniform(k5, (C, H), jnp.float32, -bound, bound)
    lamb = jnp.float32(0.3)

    out = head_forward(x, lamb, wk1, wq1, wk2, wq2, wv)
    out = jax.block_until_ready(out)

    ref = _reference(x, lamb, wk1, wq1, wk2, wq2, wv)
    assert out.shape == (B, T, H)
    # bf16 MXU inputs -> compare against the f32 reference with mixed-precision
    # tolerance (normalization/reductions are kept in f32, reciprocal is exact).
    assert jnp.allclose(out, ref, atol=5e-2, rtol=5e-2)
    print("KERNEL_OK")
</pallas_src>

<mosaic_0001>
module attributes {stable_mosaic.version = 11 : i64} {
  func.func @_proj_kernel(%arg0: i32, %arg1: i32, %arg2: memref<1x8x32xbf16, #tpu.memory_space<vmem>>, %arg3: memref<32x640xbf16, #tpu.memory_space<vmem>>, %arg4: memref<1x8x256xbf16, #tpu.memory_space<vmem>>, %arg5: memref<1x8x384xbf16, #tpu.memory_space<vmem>>) attributes {dimension_semantics = [#tpu.dimension_semantics<parallel>, #tpu.dimension_semantics<parallel>], iteration_bounds = array<i64: 2, 1>, scalar_prefetch = 0 : i64, scratch_operands = 0 : i64, tpu.core_type = #tpu.core_type<tc>, window_params = [{transform_indices = @transform_0, window_bounds = array<i64: 1, 8, 32>}, {pipeline_mode = #tpu.pipeline_mode<synchronous>, transform_indices = @transform_1, window_bounds = array<i64: 32, 640>}, {transform_indices = @transform_2, window_bounds = array<i64: 1, 8, 256>}, {transform_indices = @transform_3, window_bounds = array<i64: 1, 8, 384>}]} {
    %c0 = arith.constant 0 : index
    %c0_0 = arith.constant 0 : index
    %c0_1 = arith.constant 0 : index
    %0 = vector.load %arg2[%c0, %c0_0, %c0_1] : memref<1x8x32xbf16, #tpu.memory_space<vmem>>, vector<1x8x32xbf16>
    %1 = vector.shape_cast %0 : vector<1x8x32xbf16> to vector<8x32xbf16>
    %c0_2 = arith.constant 0 : index
    %c0_3 = arith.constant 0 : index
    %2 = vector.load %arg3[%c0_2, %c0_3] : memref<32x640xbf16, #tpu.memory_space<vmem>>, vector<32x640xbf16>
    %cst = arith.constant dense<0.000000e+00> : vector<8x640xf32>
    %3 = tpu.matmul %1, %2, %cst {dimension_numbers = #tpu.dot_dimension_numbers<[1], [0], [0], [1], [0, 0, 1, 1], [], []>} : vector<8x32xbf16>, vector<32x640xbf16>, vector<8x640xf32> -> vector<8x640xf32>
    %4 = vector.extract_strided_slice %3 {offsets = [0, 0], sizes = [8, 256], strides = [1, 1]} : vector<8x640xf32> to vector<8x256xf32>
    %5 = arith.truncf %4 : vector<8x256xf32> to vector<8x256xbf16>
    %c0_4 = arith.constant 0 : index
    %c0_5 = arith.constant 0 : index
    %c0_6 = arith.constant 0 : index
    %6 = vector.load %arg4[%c0_4, %c0_5, %c0_6] : memref<1x8x256xbf16, #tpu.memory_space<vmem>>, vector<1x8x256xbf16>
    %7 = vector.shape_cast %6 : vector<1x8x256xbf16> to vector<8x256xbf16>
    %8 = vector.shape_cast %5 : vector<8x256xbf16> to vector<1x8x256xbf16>
    tpu.vector_store %arg4[%c0_4, %c0_5, %c0_6], %8 {strides = array<i32>} : memref<1x8x256xbf16, #tpu.memory_space<vmem>>, vector<1x8x256xbf16>,
    %9 = vector.extract_strided_slice %3 {offsets = [0, 256], sizes = [8, 384], strides = [1, 1]} : vector<8x640xf32> to vector<8x384xf32>
    %10 = arith.truncf %9 : vector<8x384xf32> to vector<8x384xbf16>
    %c0_7 = arith.constant 0 : index
    %c0_8 = arith.constant 0 : index
    %c0_9 = arith.constant 0 : index
    %11 = vector.load %arg5[%c0_7, %c0_8, %c0_9] : memref<1x8x384xbf16, #tpu.memory_space<vmem>>, vector<1x8x384xbf16>
    %12 = vector.shape_cast %11 : vector<1x8x384xbf16> to vector<8x384xbf16>
    %13 = vector.shape_cast %10 : vector<8x384xbf16> to vector<1x8x384xbf16>
    tpu.vector_store %arg5[%c0_7, %c0_8, %c0_9], %13 {strides = array<i32>} : memref<1x8x384xbf16, #tpu.memory_space<vmem>>, vector<1x8x384xbf16>,
    return
  }
  func.func @transform_0(%arg0: i32, %arg1: i32) -> (i32, i32, i32) {
    %c0_i32 = arith.constant 0 : i32
    %c0_i32_0 = arith.constant 0 : i32
    return %arg0, %arg1, %c0_i32 : i32, i32, i32
  }
  func.func @transform_1(%arg0: i32, %arg1: i32) -> (i32, i32) {
    %c0_i32 = arith.constant 0 : i32
    %c0_i32_0 = arith.constant 0 : i32
    %c0_i32_1 = arith.constant 0 : i32
    return %c0_i32, %c0_i32_0 : i32, i32
  }
  func.func @transform_2(%arg0: i32, %arg1: i32) -> (i32, i32, i32) {
    %c0_i32 = arith.constant 0 : i32
    %c0_i32_0 = arith.constant 0 : i32
    return %arg0, %arg1, %c0_i32 : i32, i32, i32
  }
  func.func @transform_3(%arg0: i32, %arg1: i32) -> (i32, i32, i32) {
    %c0_i32 = arith.constant 0 : i32
    %c0_i32_0 = arith.constant 0 : i32
    return %arg0, %arg1, %c0_i32 : i32, i32, i32
  }
}

</mosaic_0001>

<bundles_post_ra>
// kernel: tpu_custom_call.1
= control target key start
LH: loop header
LB: loop body
LE: loop exit
PB: predicated region body
PF: predicated region fallthrough
CT: control target
= control target key end

     0   :  { %9 = vsyncpa [#allocation3], 0  ;;  %s1066_s0 = inlined_call_operand.hbm [shape: bf16[2,8,32], index: 0, kind: input, shape index: {}]   ;;  %s1067_s1 = inlined_call_operand.hbm [shape: bf16[32,640], index: 1, kind: input, shape index: {}]   ;;  %s1068_s2 = inlined_call_operand.hbm [shape: bf16[2,8,256], index: 2, kind: output, shape index: {0}]   ;;  %s1069_s3 = inlined_call_operand.hbm [shape: bf16[2,8,384], index: 3, kind: output, shape index: {1}]  }
   0x1   :  { %11 = vsyncpa [#allocation3 + $0x1], 0 }
   0x2   :  { %12 = vsyncpa [#allocation6], 0 }
   0x3   :  { %13 = vsyncpa [#allocation4], 0 }
   0x4   :  { %15 = vsyncpa [#allocation4 + $0x1], 0 }
   0x5   :  { %16 = vsyncpa [#allocation9], 0 }
   0x6   :  { %18 = vsyncpa [#allocation9 + $0x1], 0  ;;  %s903_s12 = smov 0   ;;  %s905_s13 = smov 0  }
   0x7   :  { %s907_s14 = smov 0   ;;  %s909_s15 = smov 0  }
   0x8   :  { %s911_s16 = smov 0   ;;  %s913_s17 = smov 0  }
   0x9 LB: > { %s545_s18 = sadd.s32 4294967295, %s878_s17   ;;  %p547_p0 = scmp.ge.s32.totalorder %s878_s17, 1  ;;  %s878_s17 = sphi %s913_s17, %s24_s17   ;;  %s874_s16 = sphi %s911_s16, %s1080_s16   ;;  %s870_s15 = sphi %s909_s15, %s1079_s15   ;;  %s866_s14 = sphi %s907_s14, %s1078_s14   ;;  %s862_s13 = sphi %s905_s13, %s1077_s13   ;;  %s858_s12 = sphi %s903_s12, %s1076_s12  }
   0xa   : > { %p935_p1 = scmp.eq.s32.totalorder %s545_s18, 0  ;;  %p146_p2 = scmp.lt.s32.totalorder %s878_s17, 3 }
   0xb   : > { %s157_s22 = sshll.u32 %s1067_s1, 4  ;;  %s880_s24 = smov [#allocation5]   ;;  %s158_s22 = int_to_ptr.hbm [resolvable:$true] %s157_s22 }
   0xc   : > { %p943_p3 = pnand %p547_p0, %p146_p2  ;;  %s159_s25 = sshll.u32 %s880_s24, 4  ;;  %s160_s25 = int_to_ptr.vmem [resolvable:$true] %s159_s25 }
   0xd   : > { %p549_p6 = scmp.ge.s32.totalorder %s878_s17, 2  ;;  %s881_s26 = smov 320  }
   0xe   : > { %p630_p4 = pneg %p943_p3  ;;  %s882_s27 = smov 20  }
   0xf   : > { %s546_s28 = sadd.s32 4294967294, %s878_s17   ;;  %s36_s29 = sadd.s32 1, %s874_s16 }
  0x10   : > { %p631_p5 = pnand %p630_p4, %p935_p1  ;;  %s45_s30 = sadd.s32 1, %s866_s14 }
  0x11   : > { %p38_p7 = scmp.ge.s32.totalorder %s36_s29, 2  ;;  %p52_p8 = scmp.ne.s32.totalorder %s866_s14, %s862_s13 }
  0x12   : > { %633 = dma.hbm_to_vmem [thread:$0]  (!%p631_p5), %s158_s22, 1280, %s160_s25, [#allocation6], %s881_s26, %s881_s26, %s882_s27  }
  0x13   : > { %p53_p9 = scmp.eq.s32.totalorder %s878_s17, 0  ;;  %p58_p10 = scmp.ne.s32.totalorder %s862_s13, %s858_s12 }
  0x14   : > { %s1082_s29 = smov (%p38_p7, %s36_s29), 0  ;;  %p105_p13 = scmp.eq.s32.totalorder %s545_s18, 1 }
  0x15   : > { %p962_p11 = por %p53_p9, %p52_p8  ;;  %p968_p12 = por %p935_p1, %p58_p10 }
  0x16   : > { %s40_s6 = ssub.s32 %s874_s16, %s1082_s29  ;;  %p111_p2 = scmp.eq.s32.totalorder %s546_s28, 1 }
  0x17   : > { %p43_p0 = scmp.eq.s32.totalorder %s40_s6, 0  ;;  %p974_p4 = por %p105_p13, %p52_p8 }
  0x18   : > { %p646_p5 = scmp.lt.s32.totalorder %s878_s17, 2  ;;  %p982_p7 = por %p111_p2, %p58_p10 }
  0x19   : > { %s980_s8 = scalar_select %p43_p0, %s866_s14, %s45_s30  }
  0x1a   : > { %s173_s10 = sand.u32 1, %s866_s14   ;;  %s551_s20 = sshll.u32 %s874_s16, 2 }
  0x1b   : > { %s550_s11 = sshll.u32 %s173_s10, 2  ;;  %s182_s18 = scalar_lea.hbm %s1066_s0, %s551_s20 }
  0x1c   : > { %s177_s24 = scalar_lea.vmem [#allocation2], %s550_s11  ;;  %s184_s26 = sshll.u32 %s182_s18, 4  ;;  %s185_s26 = int_to_ptr.hbm [resolvable:$true] %s184_s26 }
  0x1d   : > { %s186_s25 = sshll.u32 %s177_s24, 4  ;;  %p635_p8 = pnand %p646_p5, %p962_p11  ;;  %s187_s25 = int_to_ptr.vmem [resolvable:$true] %s186_s25 }
  0x1e   : > { %s174_s27 = scalar_lea.sflag [#allocation3], %s173_s10  ;;  %195 = sbr.rel (%p943_p3) target bundleno = 198 (0xc6), region = 28 }
  0x1f   : > { %637 = dma.hbm_to_vmem [thread:$0]  (!%p635_p8), %s185_s26, 64, %s187_s25, %s174_s27  }
  0x20   : > { %s996_s28 = sand.u32 (!%p943_p3), 1, %s862_s13  }
  0x21   : > { %s553_s30 = sshll.u32 (!%p943_p3), %s996_s28, 2  ;;  %s198_s6 = scalar_lea.sflag (!%p943_p3), [#allocation3], %s996_s28 }
  0x22   : > { %s1000_s11 = scalar_lea.vmem (!%p943_p3), [#allocation2], %s553_s30 }
  0x23   : > { %841 = dma.done.wait (%p968_p12), %s198_s6, 64  }
  0x24   : > { %843 = vsyncadd (%p968_p12), %s198_s6, 4294967232 }
  0x25   : > { %845 = dma.done.wait (%p935_p1), [#allocation6], 1280  }
  0x26   : > { %847 = vsyncadd (%p935_p1), [#allocation6], 4294966016  ;;  %v578_v0 = vld [vmem:[#allocation5 + $0x28] sm:$0xf]  ;;  %v614_v1 = vld [vmem:[#allocation5 + $0x38] sm:$0xf0] }
  0x27   : > { %v612_v2 = vld [vmem:[#allocation5 + $0x2c] sm:$0xf]  ;;  %v579_v3 = vor.u32 %v614_v1, %v578_v0  ;;  %v580_v4 = vld [vmem:[#allocation5 + $0x3c] sm:$0xf0]  ;;  %v586_v5 = vld [vmem:[#allocation5 + $0x30] sm:$0xf] }
  0x28   : > { %v615_v6 = vld [vmem:[#allocation5 + $0x40] sm:$0xf0]  ;;  %v583_v7 = vor.u32 %v612_v2, %v580_v4  ;;  %v613_v9 = vld [vmem:[#allocation5 + $0x34] sm:$0xf]  ;;  %v588_v10 = vld [vmem:[#allocation5 + $0x44] sm:$0xf0] }
  0x29   : > { %v587_v8 = vor.u32 %v615_v6, %v586_v5  ;;  %v558_v11 = vld [vmem:[#allocation5] sm:$0xf]  ;;  %311 = vmatpush.bf16.msra.mxu0 %v579_v3  ;;  %v591_v12 = vor.u32 %v613_v9, %v588_v10  ;;  %v609_v13 = vld [vmem:[#allocation5 + $0x10] sm:$0xf0]  ;;  %v607_v14 = vld [vmem:[#allocation5 + $0x4] sm:$0xf] }
  0x2a   : > { %v560_v15 = vld [vmem:[#allocation5 + $0x14] sm:$0xf0]  ;;  %324 = vmatpush.bf16.msra.mxu1 %v583_v7  ;;  %v559_v16 = vor.u32 %v609_v13, %v558_v11  ;;  %v566_v18 = vld [vmem:[#allocation5 + $0x8] sm:$0xf]  ;;  %v610_v19 = vld [vmem:[#allocation5 + $0x18] sm:$0xf0] }
  0x2b   : > { %337 = vmatpush.bf16.msra.mxu2 %v587_v8  ;;  %v563_v17 = vor.u32 %v607_v14, %v560_v15  ;;  %v608_v20 = vld [vmem:[#allocation5 + $0xc] sm:$0xf]  ;;  %350 = vmatpush.bf16.msra.mxu3 %v591_v12  ;;  %v567_v21 = vor.u32 %v610_v19, %v566_v18  ;;  %v568_v22 = vld [vmem:[#allocation5 + $0x1c] sm:$0xf0]  ;;  %v594_v23 = vld [vmem:[#allocation5 + $0x38] sm:$0xf] }
  0x2c   : > { %v571_v24 = vor.u32 %v608_v20, %v568_v22  ;;  %v616_v25 = vld [vmem:[#allocation5 + $0x48] sm:$0xf0]  ;;  %v574_v26 = vld [vmem:[#allocation5 + $0x10] sm:$0xf]  ;;  %v611_v27 = vld [vmem:[#allocation5 + $0x20] sm:$0xf0] }
  0x2d   : > { %312 = vmatpush.bf16.msra.mxu0 %v559_v16  ;;  %v236_v28 = vld [vmem:[%s1000_s11] sm:$0xf]  ;;  %vm301_vm0 = vcmask 261120   ;;  %v595_v29 = vor.u32 %v616_v25, %v594_v23  ;;  %v575_v30 = vor.u32 %v611_v27, %v574_v26  ;;  %s617_s19 = sshll.u32 %s870_s15, 3  ;;  %s555_s23 = sshll.u32 %s996_s28, 3 }
  0x2e   : > { %325 = vmatpush.bf16.msra.mxu1 %v563_v17  ;;  %s395_s10 = scalar_lea.hbm %s1068_s2, %s617_s19  ;;  %s227_s20 = scalar_lea.vmem [#allocation7], %s555_s23 }
  0x2f   : > { %338 = vmatpush.bf16.msra.mxu2 %v567_v21  ;;  %351 = vmatpush.bf16.msra.mxu3 %v571_v24  ;;  %s397_s21 = sshll.u32 %s227_s20, 4  ;;  %s399_s22 = sshll.u32 %s395_s10, 4  ;;  %s398_s21 = int_to_ptr.vmem [resolvable:$true] %s397_s21  ;;  %s400_s22 = int_to_ptr.hbm [resolvable:$true] %s399_s22 }
  0x30   : > { %596 = vmatmul.msk.bf16.vlgmr.msra.gmra.mxu0 %vm301_vm0, %v236_v28  ;;  %s618_s18 = smul.u32 12, %s996_s28  ;;  %s377_s24 = scalar_lea.sflag [#allocation4], %s996_s28 }
  0x31   : > { %363 = vmatpush.bf16.msrb.mxu0 %v595_v29  ;;  %597 = vmatmul.msk.bf16.vlgmr.msra.gmra.mxu1 %vm301_vm0, %v236_v28  ;;  %s774_s25 = sshra.s32 %s400_s22, 4  ;;  %s780_s6 = scalar_lea.hbm %s1068_s2, 16  ;;  %s775_s25 = int_to_ptr.hbm [resolvable:$true] %s774_s25 }
  0x32   : > { %598 = vmatmul.msk.bf16.vlgmr.msra.gmra.mxu2 %vm301_vm0, %v236_v28  ;;  %599 = vmatmul.msk.bf16.vlgmr.msra.gmra.mxu3 %vm301_vm0, %v236_v28  ;;  %s776_s26 = scalar_lea.hbm %s775_s25, 8  ;;  %p781_p10 = scmp.lt.s32.totalorder %s775_s25, %s1068_s2 }
  0x33   : > { %p777_p1 = scmp.ne.s32.totalorder %s775_s25, %s776_s26  ;;  %p782_p11 = scmp.lt.s32.totalorder %s780_s6, %s776_s26 }
  0x35   : > { %364 = vmatpush.bf16.msrb.mxu0 %v575_v30  ;;  %p778_p3 = pnand %p777_p1, %p974_p4  ;;  %p783_p12 = por %p782_p11, %p781_p10 }
  0x37   : > { %p779_p9 = pneg %p778_p3 }
  0x39   : > { %p784_p13 = pnand %p783_p12, %p779_p9 }
  0x40   : > { %600 = vmatmul.msk.bf16.vlgmr.msrb.gmra.mxu0 %vm301_vm0, %v236_v28 }
  0xad   : > { %v314_v31 = vpop.f32.mrf.mxu0 }
  0xae   : > { %v327_v32 = vpop.f32.mrf.mxu1 }
  0xaf   : > { %v370_v33 = vpack.c.bf16 %v327_v32, %v314_v31 }
  0xb1   : > { %371 = vst [vmem:[%s227_s20] sm:$0xff] %v370_v33 }
  0xb2   : > { %787 = shalt.err (!%p784_p13)
}
  0xb3   : > { %626 = dma.vmem_to_hbm [thread:$0]  (%p974_p4), %s398_s21, 128, %s400_s22, %s377_s24  }
  0xb4   : > { %s619_s23 = smul.u32 12, %s870_s15  ;;  %s234_s4 = scalar_lea.vmem [#allocation8], %s618_s18 }
  0xb5   : > { %v340_v34 = vpop.f32.mrf.mxu2  ;;  %v316_v35 = vpop.f32.mrf.mxu0  ;;  %s414_s25 = sshll.u32 %s234_s4, 4  ;;  %s382_s15 = scalar_lea.sflag [#allocation9], %s996_s28  ;;  %s415_s25 = int_to_ptr.vmem [resolvable:$true] %s414_s25 }
  0xb6   : > { %v353_v36 = vpop.f32.mrf.mxu3  ;;  %v329_v38 = vpop.f32.mrf.mxu1  ;;  %s412_s20 = scalar_lea.hbm %s1069_s3, %s619_s23  ;;  %s808_s27 = scalar_lea.hbm %s1069_s3, 24 }
  0xb7   : > { %v372_v37 = vpack.c.bf16 %v353_v36, %v340_v34  ;;  %s416_s26 = sshll.u32 %s412_s20, 4  ;;  %s417_s26 = int_to_ptr.hbm [resolvable:$true] %s416_s26 }
  0xb8   : > { %s802_s21 = sshra.s32 %s417_s26, 4  ;;  %s803_s21 = int_to_ptr.hbm [resolvable:$true] %s802_s21 }
  0xb9   : > { %374 = vst [vmem:[%s234_s4] sm:$0xff] %v372_v37  ;;  %s804_s22 = scalar_lea.hbm %s803_s21, 12  ;;  %p809_p8 = scmp.lt.s32.totalorder %s803_s21, %s1069_s3 }
  0xba   : > { %p805_p0 = scmp.ne.s32.totalorder %s803_s21, %s804_s22  ;;  %p810_p1 = scmp.lt.s32.totalorder %s808_s27, %s804_s22 }
  0xbc   : > { %p806_p2 = pnand %p805_p0, %p974_p4  ;;  %p811_p3 = por %p810_p1, %p809_p8 }
  0xbd   : > { %v342_v39 = vpop.f32.mrf.mxu2  ;;  %v366_v41 = vpop.f32.mrf.mxu0 }
  0xbe   : > { %v355_v40 = vpop.f32.mrf.mxu3  ;;  %v373_v42 = vpack.c.bf16 %v366_v41, %v366_v41  ;;  %p807_p5 = pneg %p806_p2 }
  0xc0   : > { %375 = vst [vmem:[%s234_s4 + $0x8] sm:$0xf] %v373_v42  ;;  %p812_p9 = pnand %p811_p3, %p807_p5 }
  0xc2   : > { %815 = shalt.err (!%p812_p9)
}
  0xc3   : > { %627 = dma.vmem_to_hbm [thread:$0]  (%p974_p4), %s415_s25, 192, %s417_s26, %s382_s15  }
  0xc5   : > { %v368_v43 = vpop.f32.mrf.mxu0 }
  0xc6 PF: > { %s428_s28 = sand.u32 1, %s858_s12   ;;  %p639_p10 = pnand %p549_p6, %p982_p7 }
  0xc7   : > { %s429_s11 = scalar_lea.sflag [#allocation4], %s428_s28 }
  0xc8   : > { %p640_p11 = pneg %p639_p10 }
  0xca   : > { %849 = dma.done.wait (%p640_p11), %s429_s11, 128  }
  0xcb   : > { %851 = vsyncadd (%p640_p11), %s429_s11, 4294967168  ;;  %s439_s19 = scalar_lea.sflag [#allocation9], %s428_s28 }
  0xcc   : > { %853 = dma.done.wait (%p640_p11), %s439_s19, 192  }
  0xcd   : > { %855 = vsyncadd (%p640_p11), %s439_s19, 4294967104  ;;  %s24_s17 = sadd.s32 1, %s878_s17   ;;  %s1076_s12 = smov %s862_s13 }
  0xce   : > { %p21_p12 = scmp.ge.s32.totalorder %s24_s17, 4   ;;  %s1077_s13 = smov %s866_s14 }
  0xcf   : > { %s1078_s14 = smov %s980_s8  ;;  %s1079_s15 = smov %s874_s16 }
  0xd0   : > { %s1080_s16 = smov %s1082_s29  ;;  %23 = sbr.rel (!%p21_p12) target bundleno = 9 (0x9), region = 94 }
  0xd5   :  { %445 = vsyncpa [#allocation3], 1 }
  0xd6   :  { %447 = vsyncpa [#allocation3 + $0x1], 1 }
  0xd7   :  { %448 = vsyncpa [#allocation6], 1 }
  0xd8   :  { %449 = vsyncpa [#allocation4], 1 }
  0xd9   :  { %451 = vsyncpa [#allocation4 + $0x1], 1 }
  0xda   :  { %452 = vsyncpa [#allocation9], 1 }
  0xdb   :  { %454 = vsyncpa [#allocation9 + $0x1], 1 }

</bundles_post_ra>
